<compile_context>
chip_gen: v7x
topology: tpu7x:2x2x1
jax: 0.10.0
libtpu: 0.0.40
codegen_flags: <defaults>
</compile_context>

<pallas_src>
import jax
import jax.numpy as jnp
from jax.experimental import pallas as pl
from jax.experimental.pallas import tpu as pltpu


# ----------------------------------------------------------------------------
# Pallas kernel: out = where(sal >= 0.5, feature, 0)
#   f_ref : (NB, TC, HW)          VMEM
#   s_ref : (NB, 1|TC, HW)        VMEM (channel broadcast handled by jnp.where)
#   o_ref : (NB, TC, HW)          VMEM
# ----------------------------------------------------------------------------
def _kaa_kernel(f_ref, s_ref, o_ref):
    f = f_ref[...]
    s = s_ref[...]
    o_ref[...] = jnp.where(s >= jnp.asarray(0.5, s.dtype),
                           f, jnp.zeros_like(f)).astype(o_ref.dtype)


def _divisors(n):
    return [d for d in range(1, n + 1) if n % d == 0]


def _choose_tiles(N, C, HW, itemsize):
    """Pick (NB, TC): images per step and channels per step."""
    TARGET = 2 * 1024 * 1024   # ~2 MiB per block buffer (85%+ of HBM roofline)
    MIN_BLK = 512 * 1024       # amortize the ~0.35 us per-grid-step overhead

    row_bytes = HW * itemsize

    # Channel tile: full C if it fits, else the largest multiple-of-8 divisor
    # of C that keeps the block under TARGET (multiple-of-8 satisfies the
    # (8,128) sublane constraint without relying on the full-dim exception).
    if C * row_bytes <= TARGET:
        TC = C
    else:
        cands = [d for d in _divisors(C) if d % 8 == 0 and d * row_bytes <= TARGET]
        TC = max(cands) if cands else C  # full C is always layout-legal

    # Batch tile: only batch multiple images per step when channels are
    # untiled (small problems); keep >= 2 grid steps so v7x megacore is fed.
    NB = 1
    if TC == C and N > 1:
        per_img = C * row_bytes
        max_nb = max(1, N // 2)
        cands = [d for d in _divisors(N) if d <= max_nb and d * per_img <= TARGET]
        big_enough = [d for d in cands if d * per_img >= MIN_BLK]
        if big_enough:
            NB = min(big_enough)      # smallest block that hits MIN_BLK -> more steps
        elif cands:
            NB = max(cands)           # otherwise as big as the step budget allows
    return NB, TC


def kaa_forward(feature, sal, *, donate_feature=False):
    """feature: (N, C, H, W); sal: (N, 1, H, W) or (N, C, H, W). NCHW float."""
    N, C, H, W = feature.shape
    Ns, Cs, Hs, Ws = sal.shape
    assert (Ns, Hs, Ws) == (N, H, W) and Cs in (1, C), (feature.shape, sal.shape)

    HW = H * W
    f_item = jnp.dtype(feature.dtype).itemsize
    s_item = jnp.dtype(sal.dtype).itemsize

    # Lane-dense 3-D views: last (lane) dim HW is a multiple of 128 for typical
    # feature maps -> unmasked vst, full VPU lane utilization.
    f2 = feature.reshape(N, C, HW)
    s2 = sal.reshape(N, Cs, HW)

    NB, TC = _choose_tiles(N, C, HW, f_item)
    grid = (N // NB, pl.cdiv(C, TC))

    feat_spec = pl.BlockSpec((NB, TC, HW), lambda n, c: (n, c, 0))
    out_spec = pl.BlockSpec((NB, TC, HW), lambda n, c: (n, c, 0))
    if Cs == 1:
        # Saliency tile is resident across the channel axis; broadcast in vregs.
        sal_spec = pl.BlockSpec((NB, 1, HW), lambda n, c: (n, 0, 0))
        sal_blk_bytes = NB * 1 * HW * s_item
    else:
        sal_spec = pl.BlockSpec((NB, TC, HW), lambda n, c: (n, c, 0))
        sal_blk_bytes = NB * TC * HW * s_item

    blk_bytes = NB * TC * HW * f_item
    # Double-buffered feature + sal + out blocks, 2x headroom; respect v7x's
    # smaller VMEM by never asking past 48 MiB, never below 16 MiB.
    vmem_needed = 2 * (2 * blk_bytes + sal_blk_bytes)
    vmem_limit = int(min(48 * 2**20, max(2 * vmem_needed, 16 * 2**20)))

    cost = pl.CostEstimate(
        flops=2 * N * C * HW,                      # compare + select per element
        transcendentals=0,
        bytes_accessed=2 * N * C * HW * f_item + N * Cs * HW * s_item,
    )

    out = pl.pallas_call(
        _kaa_kernel,
        out_shape=jax.ShapeDtypeStruct((N, C, HW), feature.dtype),
        grid=grid,
        in_specs=[feat_spec, sal_spec],
        out_specs=out_spec,
        compiler_params=pltpu.CompilerParams(
            dimension_semantics=("parallel", "parallel"),
            vmem_limit_bytes=vmem_limit),
        cost_estimate=cost,
        input_output_aliases=({0: 0} if donate_feature else {}),
    )(f2, s2)
    return out.reshape(N, C, H, W)


# ----------------------------------------------------------------------------
# Pure-JAX reference (mirrors the PyTorch forward exactly)
# ----------------------------------------------------------------------------
def kaa_forward_ref(feature, sal):
    sal0_1 = jnp.where(sal >= 0.5, 1.0, 0.0).astype(feature.dtype)
    return feature * sal0_1


if __name__ == "__main__":
    N, C, H, W = 2, 4, 16, 16
    key = jax.random.PRNGKey(0)
    k_feat, k_sal, k_salc = jax.random.split(key, 3)

    feature = jax.random.normal(k_feat, (N, C, H, W), jnp.float32)   # NCHW
    sal1 = jax.random.uniform(k_sal, (N, 1, H, W), jnp.float32)      # 1-channel saliency
    salc = jax.random.uniform(k_salc, (N, C, H, W), jnp.float32)     # C-channel saliency

    fwd = jax.jit(kaa_forward)

    # Broadcast (Cs == 1) path.
    out1 = jax.block_until_ready(fwd(feature, sal1))
    ref1 = kaa_forward_ref(feature, sal1)
    assert out1.shape == (N, C, H, W), out1.shape
    assert jnp.allclose(out1, ref1, rtol=1e-6, atol=1e-6), (
        float(jnp.max(jnp.abs(out1 - ref1))))

    # Full-channel (Cs == C) path.
    outc = jax.block_until_ready(fwd(feature, salc))
    refc = kaa_forward_ref(feature, salc)
    assert jnp.allclose(outc, refc, rtol=1e-6, atol=1e-6), (
        float(jnp.max(jnp.abs(outc - refc))))

    print("KERNEL_OK")
</pallas_src>

<mosaic_0001>
module attributes {stable_mosaic.version = 11 : i64} {
  func.func @_kaa_kernel(%arg0: i32, %arg1: i32, %arg2: memref<1x4x256xf32, #tpu.memory_space<vmem>>, %arg3: memref<1x1x256xf32, #tpu.memory_space<vmem>>, %arg4: memref<1x4x256xf32, #tpu.memory_space<vmem>>) attributes {dimension_semantics = [#tpu.dimension_semantics<parallel>, #tpu.dimension_semantics<parallel>], iteration_bounds = array<i64: 2, 1>, scalar_prefetch = 0 : i64, scratch_operands = 0 : i64, tpu.core_type = #tpu.core_type<tc>, window_params = [{transform_indices = @transform_0, window_bounds = array<i64: 1, 4, 256>}, {transform_indices = @transform_1, window_bounds = array<i64: 1, 1, 256>}, {transform_indices = @transform_2, window_bounds = array<i64: 1, 4, 256>}]} {
    %c0 = arith.constant 0 : index
    %c0_0 = arith.constant 0 : index
    %c0_1 = arith.constant 0 : index
    %0 = vector.load %arg2[%c0, %c0_0, %c0_1] : memref<1x4x256xf32, #tpu.memory_space<vmem>>, vector<1x4x256xf32>
    %c0_2 = arith.constant 0 : index
    %c0_3 = arith.constant 0 : index
    %c0_4 = arith.constant 0 : index
    %1 = vector.load %arg3[%c0_2, %c0_3, %c0_4] : memref<1x1x256xf32, #tpu.memory_space<vmem>>, vector<1x1x256xf32>
    %cst = arith.constant 5.000000e-01 : f32
    %2 = vector.broadcast %cst : f32 to vector<1x1x256xf32>
    %3 = arith.cmpf oge, %1, %2 : vector<1x1x256xf32>
    %cst_5 = arith.constant 0.000000e+00 : f32
    %4 = vector.broadcast %cst_5 : f32 to vector<1x4x256xf32>
    %5 = vector.shape_cast %3 : vector<1x1x256xi1> to vector<1x1x256xi1>
    %6 = vector.broadcast %5 : vector<1x1x256xi1> to vector<1x4x256xi1>
    %7 = arith.select %6, %0, %4 : vector<1x4x256xi1>, vector<1x4x256xf32>
    %c0_6 = arith.constant 0 : index
    %c0_7 = arith.constant 0 : index
    %c0_8 = arith.constant 0 : index
    %8 = vector.load %arg4[%c0_6, %c0_7, %c0_8] : memref<1x4x256xf32, #tpu.memory_space<vmem>>, vector<1x4x256xf32>
    tpu.vector_store %arg4[%c0_6, %c0_7, %c0_8], %7 {strides = array<i32>} : memref<1x4x256xf32, #tpu.memory_space<vmem>>, vector<1x4x256xf32>,
    return
  }
  func.func @transform_0(%arg0: i32, %arg1: i32) -> (i32, i32, i32) {
    %c0_i32 = arith.constant 0 : i32
    %c0_i32_0 = arith.constant 0 : i32
    return %arg0, %arg1, %c0_i32 : i32, i32, i32
  }
  func.func @transform_1(%arg0: i32, %arg1: i32) -> (i32, i32, i32) {
    %c0_i32 = arith.constant 0 : i32
    %c0_i32_0 = arith.constant 0 : i32
    %c0_i32_1 = arith.constant 0 : i32
    return %arg0, %c0_i32, %c0_i32_0 : i32, i32, i32
  }
  func.func @transform_2(%arg0: i32, %arg1: i32) -> (i32, i32, i32) {
    %c0_i32 = arith.constant 0 : i32
    %c0_i32_0 = arith.constant 0 : i32
    return %arg0, %arg1, %c0_i32 : i32, i32, i32
  }
}

</mosaic_0001>

<bundles_post_ra>
// kernel: kaa_forward.1
= control target key start
LH: loop header
LB: loop body
LE: loop exit
PB: predicated region body
PF: predicated region fallthrough
CT: control target
= control target key end

     0   :  { %s405_s9 = smov 0   ;;  %s407_s10 = smov 0   ;;  %s441_s0 = inlined_call_operand.vmem [shape: f32[2,4,256], index: 0, kind: input, shape index: {}]   ;;  %s442_s1 = inlined_call_operand.vmem [shape: f32[2,1,256], index: 1, kind: input, shape index: {}]   ;;  %s443_s2 = inlined_call_operand.vmem [shape: f32[2,4,256], index: 2, kind: output, shape index: {}]  }
   0x1   :  { %s409_s11 = smov 0  }
   0x2 LB: > { %s24_s12 = sadd.s32 1, %s383_s10  ;;  %p329_p0 = scmp.ge.s32.totalorder %s387_s11, 1  ;;  %s387_s11 = sphi %s409_s11, %s12_s11   ;;  %s383_s10 = sphi %s407_s10, %s445_s10   ;;  %s379_s9 = sphi %s405_s9, %s444_s9  }
   0x3   : > { %p26_p1 = scmp.ge.s32.totalorder %s24_s12, 2  ;;  %p141_p2 = scmp.lt.s32.totalorder %s387_s11, 3 }
   0x5   : > { %s447_s12 = smov (%p26_p1, %s24_s12), 0  ;;  %p142_p3 = pnand %p329_p0, %p141_p2 }
   0x6   : > { %p175_p4 = scmp.lt.s32.totalorder (!%p142_p3), %s379_s9, 1  ;;  %v201_v0 = vlaneseq (!%p142_p3)  ;;  %v389_v6 = vmov (!%p142_p3), 0  }
   0x7   : > { %145 = sbr.rel (%p142_p3) target bundleno = 28 (0x1c), region = 28 }
   0x8   : > { %v202_v1 = vshrl.u32 (!%p142_p3), %v201_v0, 7 }
   0xa   : > { %v203_v2 = vsub.s32 (!%p142_p3), 0, %v202_v1  ;;  %v207_v3 = vsub.s32 (!%p142_p3), 1, %v202_v1 }
   0xe   : > { %s449_s9 = smov (!%p175_p4, %s379_s9), 1 }
   0xf   : > { %s337_s13 = sshll.u32 %s449_s9, 3  ;;  %s332_s14 = sshll.u32 %s449_s9, 1 }
  0x10   : > { %s183_s17 = scalar_lea.vmem %s441_s0, %s337_s13  ;;  %s187_s20 = scalar_lea.vmem %s442_s1, %s332_s14 }
  0x11   : > { %v197_v4 = vld [vmem:[%s183_s17] sm:$0xff]  ;;  %s196_s23 = scalar_lea.vmem %s443_s2, %s337_s13 }
  0x12   : > { %v198_v5 = vld [vmem:[%s187_s20] sm:$0x3]  ;;  %v212_v8 = vcombine.high %v197_v4, %v197_v4 }
  0x13   : > { %vm199_vm0 = vcmp.ge.f32.partialorder %v198_v5, 0.5 }
  0x14   : > { %v200_v7 = vsel %vm199_vm0, 1, %v389_v6 }
  0x15   : > { %v204_v9 = vrot.slane %v200_v7, %v203_v2  ;;  %v208_v10 = vrot.slane %v200_v7, %v207_v3 }
  0x17   : > { %vm209_vm1 = vcmp.eq.s32.totalorder %v204_v9, 1  ;;  %vm210_vm2 = vcmp.eq.s32.totalorder %v208_v10, 1 }
  0x18   : > { %v214_v11 = vsel %vm209_vm1, %v197_v4, 0.0  ;;  %v215_v12 = vsel %vm210_vm2, %v212_v8, 0.0 }
  0x19   : > { %v218_v13 = vcombine.low %v214_v11, %v215_v12 }
  0x1b   : > { %220 = vst [vmem:[%s196_s23] sm:$0xff] %v218_v13 }
  0x1c PF: > { %s12_s11 = sadd.s32 1, %s387_s11   ;;  %s444_s9 = smov %s383_s10 }
  0x1d   : > { %p9_p5 = scmp.ge.s32.totalorder %s12_s11, 4   ;;  %s445_s10 = smov %s447_s12 }
  0x1f   :  { %11 = sbr.rel (!%p9_p5) target bundleno = 2 (0x2), region = 61 }

</bundles_post_ra>
